<compile_context>
chip_gen: v5e
topology: v5e:2x2
jax: 0.10.0
libtpu: 0.0.40
codegen_flags: <defaults>
</compile_context>

<pallas_src>
import functools
import math

import jax
import jax.numpy as jnp
from jax.experimental import pallas as pl
from jax.experimental.pallas import tpu as pltpu


def _round_up(x, m):
    return (x + m - 1) // m * m


def _vmem_limit_bytes():
    # Generation-aware VMEM budget: ~3/4 of physical capacity, >= 32 MiB.
    cap = 64 * 1024 * 1024
    try:
        info = pltpu.get_tpu_info()
        cap = int(getattr(info, "vmem_capacity_bytes", cap))
    except Exception:
        pass
    return max(32 * 1024 * 1024, cap * 3 // 4)


def _sdpa_kernel(q_ref, k_ref, v_ref, o_ref, w_ref, *,
                 inv_sqrt_dk, use_bf16_matmul):
    # Blocks: q (1, TQ, Dp), k/v (1, S, Dp), o (1, TQ, Dp), w (1, TQ, S).
    mxu_dtype = jnp.bfloat16 if use_bf16_matmul else jnp.float32

    q = (q_ref[0] * inv_sqrt_dk).astype(mxu_dtype)   # fold 1/sqrt(d_k) into Q
    k = k_ref[0].astype(mxu_dtype)                   # (S, Dp)
    v = v_ref[0].astype(mxu_dtype)                   # (S, Dp)

    # scores = (Q / sqrt(d_k)) @ K^T, contracted on D (no k.T materialization),
    # bf16 MXU operands, f32 accumulation.
    scores = jax.lax.dot_general(
        q, k,
        dimension_numbers=(((1,), (1,)), ((), ())),
        preferred_element_type=jnp.float32,
    )                                                # (TQ, S) f32

    # Numerically stable softmax over the key axis (f32).
    m = jnp.max(scores, axis=-1, keepdims=True)
    p = jnp.exp(scores - m)
    denom = jnp.sum(p, axis=-1, keepdims=True)
    # Exact reciprocal: only (TQ, 1) elements, and these weights are returned.
    weights = p * (1.0 / denom)                      # (TQ, S) f32, rows sum ~1

    w_ref[0] = weights.astype(w_ref.dtype)

    # output = weights @ V on the MXU (bf16 operands, f32 accumulation).
    out = jnp.dot(weights.astype(mxu_dtype), v,
                  preferred_element_type=jnp.float32)   # (TQ, Dp)
    o_ref[0] = out.astype(o_ref.dtype)


def scaled_dot_product_attention(Q, K, V, *, q_tile=256, use_bf16_matmul=True):
    """Q, K, V: [B, S, D] float32. Returns (output [B,S,D], weights [B,S,S])."""
    B, S, D = Q.shape
    assert K.shape == (B, S, D) and V.shape == (B, S, D)

    # Only the lane (last) dim needs a multiple of 128; a block dim equal to
    # the full array dim is always legal, so small/unaligned S needs no pad.
    D_pad = _round_up(D, 128)
    if S <= q_tile:
        tq = S                      # block dim == full array dim (legal)
        Sq_pad = S
    else:
        tq = q_tile                 # q_tile is a multiple of 8/128
        Sq_pad = _round_up(S, tq)
    num_q_tiles = Sq_pad // tq

    def pad_to(x, seq_pad):
        if seq_pad == S and D_pad == D:
            return x
        return jnp.pad(x, ((0, 0), (0, seq_pad - S), (0, D_pad - D)))

    Qp = pad_to(Q, Sq_pad)          # query rows may be padded (sliced off later)
    Kp = pad_to(K, S)               # key/value seq axis is never padded
    Vp = pad_to(V, S)

    kernel = functools.partial(
        _sdpa_kernel,
        inv_sqrt_dk=1.0 / math.sqrt(D),   # d_k = original d_model
        use_bf16_matmul=use_bf16_matmul,
    )

    out_shapes = (
        jax.ShapeDtypeStruct((B, Sq_pad, D_pad), Q.dtype),   # attention output
        jax.ShapeDtypeStruct((B, Sq_pad, S), Q.dtype),       # attention weights
    )

    q_spec = pl.BlockSpec((1, tq, D_pad), lambda b, qi: (b, qi, 0))
    kv_spec = pl.BlockSpec((1, S, D_pad), lambda b, qi: (b, 0, 0))
    o_spec = pl.BlockSpec((1, tq, D_pad), lambda b, qi: (b, qi, 0))
    w_spec = pl.BlockSpec((1, tq, S), lambda b, qi: (b, qi, 0))

    itemsize = jnp.dtype(Q.dtype).itemsize
    cost = pl.CostEstimate(
        flops=4 * B * S * S * D,
        transcendentals=B * Sq_pad * S,
        bytes_accessed=(3 * B * S * D + B * Sq_pad * D_pad + B * Sq_pad * S)
        * itemsize,
    )

    fn = pl.pallas_call(
        kernel,
        out_shape=out_shapes,
        grid_spec=pltpu.PrefetchScalarGridSpec(
            num_scalar_prefetch=0,
            grid=(B, num_q_tiles),
            in_specs=[q_spec, kv_spec, kv_spec],
            out_specs=[o_spec, w_spec],
        ),
        compiler_params=pltpu.CompilerParams(
            dimension_semantics=("parallel", "parallel"),
            vmem_limit_bytes=_vmem_limit_bytes(),
        ),
        cost_estimate=cost,
    )
    out_p, w_p = fn(Qp, Kp, Vp)

    out = out_p if (Sq_pad == S and D_pad == D) else out_p[:, :S, :D]
    w = w_p if Sq_pad == S else w_p[:, :S, :]
    return out, w


def _reference(Q, K, V):
    d_k = Q.shape[-1]
    scores = jnp.einsum("bqd,bkd->bqk", Q, K) / jnp.sqrt(jnp.float32(d_k))
    weights = jax.nn.softmax(scores, axis=-1)
    out = jnp.einsum("bqk,bkd->bqd", weights, V)
    return out, weights


if __name__ == "__main__":
    # Shapes from the PyTorch script: batch_size=2, seq_len=10, d_model=512.
    B, S, D = 2, 10, 512
    key = jax.random.PRNGKey(0)
    kq, kk, kv = jax.random.split(key, 3)
    Q = jax.random.uniform(kq, (B, S, D), dtype=jnp.float32)
    K = jax.random.uniform(kk, (B, S, D), dtype=jnp.float32)
    V = jax.random.uniform(kv, (B, S, D), dtype=jnp.float32)

    out, weights = scaled_dot_product_attention(Q, K, V)
    out = jax.block_until_ready(out)
    weights = jax.block_until_ready(weights)

    ref_out, ref_w = _reference(Q, K, V)
    assert out.shape == (B, S, D) and weights.shape == (B, S, S)
    # Tolerances cover the bf16 MXU operands (f32 accumulation).
    assert jnp.allclose(weights, ref_w, atol=2e-3, rtol=2e-3)
    assert jnp.allclose(out, ref_out, atol=5e-3, rtol=5e-3)
    # Softmax rows sum to ~1 (exact f32 reciprocal on the returned weights).
    assert jnp.allclose(weights.sum(-1), 1.0, atol=1e-3)

    print("KERNEL_OK")
</pallas_src>

<mosaic_0001>
module attributes {stable_mosaic.version = 11 : i64} {
  func.func @_sdpa_kernel(%arg0: i32, %arg1: i32, %arg2: memref<1x10x512xf32, #tpu.memory_space<vmem>>, %arg3: memref<1x10x512xf32, #tpu.memory_space<vmem>>, %arg4: memref<1x10x512xf32, #tpu.memory_space<vmem>>, %arg5: memref<1x10x512xf32, #tpu.memory_space<vmem>>, %arg6: memref<1x10x10xf32, #tpu.memory_space<vmem>>) attributes {dimension_semantics = [#tpu.dimension_semantics<parallel>, #tpu.dimension_semantics<parallel>], iteration_bounds = array<i64: 2, 1>, scalar_prefetch = 0 : i64, scratch_operands = 0 : i64, tpu.core_type = #tpu.core_type<tc>, window_params = [{transform_indices = @transform_0, window_bounds = array<i64: 1, 10, 512>}, {transform_indices = @transform_1, window_bounds = array<i64: 1, 10, 512>}, {transform_indices = @transform_2, window_bounds = array<i64: 1, 10, 512>}, {transform_indices = @transform_3, window_bounds = array<i64: 1, 10, 512>}, {transform_indices = @transform_4, window_bounds = array<i64: 1, 10, 10>}]} {
    %c0 = arith.constant 0 : index
    %c0_0 = arith.constant 0 : index
    %c0_1 = arith.constant 0 : index
    %0 = vector.load %arg2[%c0, %c0_0, %c0_1] : memref<1x10x512xf32, #tpu.memory_space<vmem>>, vector<1x10x512xf32>
    %1 = vector.shape_cast %0 : vector<1x10x512xf32> to vector<10x512xf32>
    %cst = arith.constant 0.0441941731 : f32
    %2 = vector.broadcast %cst : f32 to vector<10x512xf32>
    %3 = arith.mulf %1, %2 : vector<10x512xf32>
    %4 = arith.truncf %3 : vector<10x512xf32> to vector<10x512xbf16>
    %c0_2 = arith.constant 0 : index
    %c0_3 = arith.constant 0 : index
    %c0_4 = arith.constant 0 : index
    %5 = vector.load %arg3[%c0_2, %c0_3, %c0_4] : memref<1x10x512xf32, #tpu.memory_space<vmem>>, vector<1x10x512xf32>
    %6 = vector.shape_cast %5 : vector<1x10x512xf32> to vector<10x512xf32>
    %7 = arith.truncf %6 : vector<10x512xf32> to vector<10x512xbf16>
    %c0_5 = arith.constant 0 : index
    %c0_6 = arith.constant 0 : index
    %c0_7 = arith.constant 0 : index
    %8 = vector.load %arg4[%c0_5, %c0_6, %c0_7] : memref<1x10x512xf32, #tpu.memory_space<vmem>>, vector<1x10x512xf32>
    %9 = vector.shape_cast %8 : vector<1x10x512xf32> to vector<10x512xf32>
    %10 = arith.truncf %9 : vector<10x512xf32> to vector<10x512xbf16>
    %cst_8 = arith.constant dense<0.000000e+00> : vector<10x10xf32>
    %11 = tpu.matmul %4, %7, %cst_8 {dimension_numbers = #tpu.dot_dimension_numbers<[1], [1], [0], [0], [0, 0, 1, 0], [], []>} : vector<10x512xbf16>, vector<10x512xbf16>, vector<10x10xf32> -> vector<10x10xf32>
    %cst_9 = arith.constant dense<0xFF800000> : vector<10xf32>
    %12 = vector.multi_reduction <maximumf>, %11, %cst_9 [1] : vector<10x10xf32> to vector<10xf32>
    %13 = vector.shape_cast %12 : vector<10xf32> to vector<10x1xf32>
    %14 = vector.broadcast %13 : vector<10x1xf32> to vector<10x10xf32>
    %15 = arith.subf %11, %14 : vector<10x10xf32>
    %16 = math.exp %15 : vector<10x10xf32>
    %cst_10 = arith.constant dense<0.000000e+00> : vector<10xf32>
    %17 = vector.multi_reduction <add>, %16, %cst_10 [1] : vector<10x10xf32> to vector<10xf32>
    %18 = vector.shape_cast %17 : vector<10xf32> to vector<10x1xf32>
    %cst_11 = arith.constant 1.000000e+00 : f32
    %19 = vector.broadcast %cst_11 : f32 to vector<10x1xf32>
    %20 = arith.divf %19, %18 : vector<10x1xf32>
    %21 = vector.broadcast %20 : vector<10x1xf32> to vector<10x10xf32>
    %22 = arith.mulf %16, %21 : vector<10x10xf32>
    %c0_12 = arith.constant 0 : index
    %c0_13 = arith.constant 0 : index
    %c0_14 = arith.constant 0 : index
    %23 = vector.load %arg6[%c0_12, %c0_13, %c0_14] : memref<1x10x10xf32, #tpu.memory_space<vmem>>, vector<1x10x10xf32>
    %24 = vector.shape_cast %23 : vector<1x10x10xf32> to vector<10x10xf32>
    %25 = vector.shape_cast %22 : vector<10x10xf32> to vector<1x10x10xf32>
    tpu.vector_store %arg6[%c0_12, %c0_13, %c0_14], %25 {strides = array<i32>} : memref<1x10x10xf32, #tpu.memory_space<vmem>>, vector<1x10x10xf32>,
    %26 = arith.truncf %22 : vector<10x10xf32> to vector<10x10xbf16>
    %cst_15 = arith.constant dense<0.000000e+00> : vector<10x512xf32>
    %27 = tpu.matmul %26, %10, %cst_15 {dimension_numbers = #tpu.dot_dimension_numbers<[1], [0], [0], [1], [0, 0, 1, 1], [], []>} : vector<10x10xbf16>, vector<10x512xbf16>, vector<10x512xf32> -> vector<10x512xf32>
    %c0_16 = arith.constant 0 : index
    %c0_17 = arith.constant 0 : index
    %c0_18 = arith.constant 0 : index
    %28 = vector.load %arg5[%c0_16, %c0_17, %c0_18] : memref<1x10x512xf32, #tpu.memory_space<vmem>>, vector<1x10x512xf32>
    %29 = vector.shape_cast %28 : vector<1x10x512xf32> to vector<10x512xf32>
    %30 = vector.shape_cast %27 : vector<10x512xf32> to vector<1x10x512xf32>
    tpu.vector_store %arg5[%c0_16, %c0_17, %c0_18], %30 {strides = array<i32>} : memref<1x10x512xf32, #tpu.memory_space<vmem>>, vector<1x10x512xf32>,
    return
  }
  func.func @transform_0(%arg0: i32, %arg1: i32) -> (i32, i32, i32) {
    %c0_i32 = arith.constant 0 : i32
    %c0_i32_0 = arith.constant 0 : i32
    return %arg0, %arg1, %c0_i32 : i32, i32, i32
  }
  func.func @transform_1(%arg0: i32, %arg1: i32) -> (i32, i32, i32) {
    %c0_i32 = arith.constant 0 : i32
    %c0_i32_0 = arith.constant 0 : i32
    %c0_i32_1 = arith.constant 0 : i32
    return %arg0, %c0_i32, %c0_i32_0 : i32, i32, i32
  }
  func.func @transform_2(%arg0: i32, %arg1: i32) -> (i32, i32, i32) {
    %c0_i32 = arith.constant 0 : i32
    %c0_i32_0 = arith.constant 0 : i32
    %c0_i32_1 = arith.constant 0 : i32
    return %arg0, %c0_i32, %c0_i32_0 : i32, i32, i32
  }
  func.func @transform_3(%arg0: i32, %arg1: i32) -> (i32, i32, i32) {
    %c0_i32 = arith.constant 0 : i32
    %c0_i32_0 = arith.constant 0 : i32
    return %arg0, %arg1, %c0_i32 : i32, i32, i32
  }
  func.func @transform_4(%arg0: i32, %arg1: i32) -> (i32, i32, i32) {
    %c0_i32 = arith.constant 0 : i32
    %c0_i32_0 = arith.constant 0 : i32
    return %arg0, %arg1, %c0_i32 : i32, i32, i32
  }
}

</mosaic_0001>

<bundles_post_ra>
// kernel: tpu_custom_call.1
= control target key start
LH: loop header
LB: loop body
LE: loop exit
PB: predicated region body
PF: predicated region fallthrough
CT: control target
= control target key end

     0   :  { %s819_s15 = smov 0   ;;  %s821_s16 = smov 0   ;;  %s891_s0 = inlined_call_operand.vmem [shape: f32[2,10,512], index: 0, kind: input, shape index: {}]   ;;  %s892_s1 = inlined_call_operand.vmem [shape: f32[2,10,512], index: 1, kind: input, shape index: {}]   ;;  %s893_s2 = inlined_call_operand.vmem [shape: f32[2,10,512], index: 2, kind: input, shape index: {}]   ;;  %s894_s3 = inlined_call_operand.vmem [shape: f32[2,10,512], index: 3, kind: output, shape index: {0}]   ;;  %s895_s4 = inlined_call_operand.vmem [shape: f32[2,10,10], index: 4, kind: output, shape index: {1}]  }
   0x1   :  { %s823_s17 = smov 0  }
   0x2 LB: > { %s27_s18 = sadd.s32 1, %s788_s16  ;;  %p716_p0 = scmp.ge.s32.totalorder %s792_s17, 1  ;;  %s792_s17 = sphi %s823_s17, %s15_s17   ;;  %s788_s16 = sphi %s821_s16, %s897_s16   ;;  %s784_s15 = sphi %s819_s15, %s896_s15  }
   0x3   : > { %p29_p1 = scmp.ge.s32.totalorder %s27_s18, 2  ;;  %p209_p2 = scmp.lt.s32.totalorder %s792_s17, 3 }
   0x5   : > { %s899_s18 = smov (%p29_p1, %s27_s18), 0  ;;  %p210_p3 = pnand %p716_p0, %p209_p2 }
   0x6   : > { %p265_p4 = scmp.lt.s32.totalorder (!%p210_p3), %s784_s15, 1 }
   0x7   : > { %213 = sbr.rel (%p210_p3) target bundleno = 580 (0x244), region = 32 }
   0xc   : > { %s901_s15 = smov (!%p265_p4, %s784_s15), 1  ;;  %vm407_vm0 = vcmask 80896   ;;  %vm411_vm1 = vcmask 74752   ;;  %vm465_vm2 = vcmask 1044480  }
   0xd   : > { %s840_s19 = sshll.u32 %s901_s15, 6  ;;  %s737_s29 = sshll.u32 %s901_s15, 4 }
   0xe   : > { %s279_s22 = scalar_lea.vmem %s892_s1, %s840_s19  ;;  %s850_s25 = scalar_lea.vmem %s891_s0, %s840_s19 }
   0xf   : > { %v327_v0 = vld [vmem:[%s279_s22] sm:$0xff]  ;;  %v328_v2 = vld [vmem:[%s279_s22 + $0x8] sm:$0xff]  ;;  %v329_v5 = vld [vmem:[%s279_s22 + $0x10] sm:$0xff]  ;;  %s284_s28 = scalar_lea.vmem %s893_s2, %s840_s19  ;;  %s304_s6 = scalar_lea.vmem %s895_s4, %s737_s29 }
  0x10   : > { %v331_v1 = vld [vmem:[%s279_s22 + $0x20] sm:$0x3]  ;;  %v332_v4 = vld [vmem:[%s279_s22 + $0x28] sm:$0x3]  ;;  %v333_v6 = vld [vmem:[%s279_s22 + $0x30] sm:$0x3]  ;;  %s294_s9 = scalar_lea.vmem %s894_s3, %s840_s19 }
  0x11   : > { %v335_v3 = vpack.c.bf16 %v331_v1, %v327_v0  ;;  %v336_v7 = vpack.c.bf16 %v332_v4, %v328_v2  ;;  %v337_v8 = vpack.c.bf16 %v333_v6, %v329_v5  ;;  %v330_v9 = vld [vmem:[%s279_s22 + $0x18] sm:$0xff]  ;;  %v307_v11 = vld [vmem:[%s850_s25] sm:$0xff]  ;;  %v308_v15 = vld [vmem:[%s850_s25 + $0x8] sm:$0xff] }
  0x12   : > { %v334_v10 = vld [vmem:[%s279_s22 + $0x38] sm:$0x3]  ;;  %v311_v13 = vld [vmem:[%s850_s25 + $0x20] sm:$0x3]  ;;  %v315_v14 = vmul.f32 0.044194173, %v307_v11 }
  0x13   : > { %358 = vmatpush.bf16.xpose.msra.mxu0 %v335_v3  ;;  %v338_v12 = vpack.c.bf16 %v334_v10, %v330_v9  ;;  %v309_v16 = vld [vmem:[%s850_s25 + $0x10] sm:$0xff]  ;;  %372 = vmatpush.bf16.xpose.msra.mxu1 %v336_v7  ;;  %v319_v17 = vmul.f32 0.044194173, %v311_v13  ;;  %v312_v18 = vld [vmem:[%s850_s25 + $0x28] sm:$0x3]  ;;  %v310_v25 = vld [vmem:[%s850_s25 + $0x18] sm:$0xff] }
  0x14   : > { %386 = vmatpush.bf16.xpose.msra.mxu2 %v337_v8  ;;  %v316_v19 = vmul.f32 0.044194173, %v308_v15  ;;  %v320_v20 = vmul.f32 0.044194173, %v312_v18  ;;  %v313_v21 = vld [vmem:[%s850_s25 + $0x30] sm:$0x3] }
  0x15   : > { %400 = vmatpush.bf16.xpose.msra.mxu3 %v338_v12  ;;  %v317_v22 = vmul.f32 0.044194173, %v309_v16  ;;  %v323_v23 = vpack.c.bf16 %v319_v17, %v315_v14  ;;  %v321_v24 = vmul.f32 0.044194173, %v313_v21  ;;  %v314_v26 = vld [vmem:[%s850_s25 + $0x38] sm:$0x3] }
  0x16   : > { %v324_v27 = vpack.c.bf16 %v320_v20, %v316_v19  ;;  %v318_v28 = vmul.f32 0.044194173, %v310_v25  ;;  %v322_v29 = vmul.f32 0.044194173, %v314_v26  ;;  %v341_v58 = vld [vmem:[%s284_s28 + $0x10] sm:$0xff]  ;;  %v342_v60 = vld [vmem:[%s284_s28 + $0x18] sm:$0xff] }
  0x17   : > { %v325_v30 = vpack.c.bf16 %v321_v24, %v317_v22  ;;  %v345_v59 = vld [vmem:[%s284_s28 + $0x30] sm:$0x3]  ;;  %v346_v62 = vld [vmem:[%s284_s28 + $0x38] sm:$0x3]  ;;  %v339_v63 = vld [vmem:[%s284_s28] sm:$0xff] }
  0x18   : > { %v326_v31 = vpack.c.bf16 %v322_v29, %v318_v28  ;;  %v349_v61 = vpack.c.bf16 %v345_v59, %v341_v58  ;;  %v343_v0 = vld [vmem:[%s284_s28 + $0x20] sm:$0x3]  ;;  %v350_v1 = vpack.c.bf16 %v346_v62, %v342_v60  ;;  %v340_v3 = vld [vmem:[%s284_s28 + $0x8] sm:$0xff] }
  0x19   : > { %v347_v2 = vpack.c.bf16 %v343_v0, %v339_v63  ;;  %v344_v4 = vld [vmem:[%s284_s28 + $0x28] sm:$0x3] }
  0x1a   : > { %359 = vmatmul.bf16.vlgmr.msra.gmra.mxu0 %v323_v23  ;;  %373 = vmatmul.bf16.vlgmr.msra.gmra.mxu1 %v324_v27  ;;  %v473_v5 = vsel %vm465_vm2, %v349_v61, 0  ;;  %v348_v6 = vpack.c.bf16 %v344_v4, %v340_v3  ;;  %v476_v7 = vsel %vm465_vm2, %v350_v1, 0 }
  0x1b   : > { %387 = vmatmul.bf16.vlgmr.msra.gmra.mxu2 %v325_v30  ;;  %v467_v8 = vsel %vm465_vm2, %v347_v2, 0 }
  0x1c   : > { %401 = vmatmul.bf16.vlgmr.msra.gmra.mxu3 %v326_v31  ;;  %513 = vmatpush.bf16.msrb.mxu2 %v473_v5  ;;  %v470_v9 = vsel %vm465_vm2, %v348_v6, 0 }
  0x1d   : > { %527 = vmatpush.bf16.msrb.mxu3 %v476_v7  ;;  %485 = vmatpush.bf16.msrb.mxu0 %v467_v8 }
  0x1e   : > { %499 = vmatpush.bf16.msrb.mxu1 %v470_v9 }
  0x97   : > { %v360_v32 = vpop.f32.mrf.mxu0  ;;  %v374_v33 = vpop.f32.mrf.mxu1 }
  0x98   : > { %v375_v34 = vadd.f32 %v374_v33, %v360_v32 }
  0x9e   : > { %v388_v35 = vpop.f32.mrf.mxu2 }
  0x9f   : > { %v389_v36 = vadd.f32 %v388_v35, %v375_v34  ;;  %v402_v37 = vpop.f32.mrf.mxu3  ;;  %v362_v39 = vpop.f32.mrf.mxu0 }
  0xa0   : > { %v376_v40 = vpop.f32.mrf.mxu1 }
  0xa1   : > { %v403_v38 = vadd.f32 %v402_v37, %v389_v36  ;;  %v377_v42 = vadd.f32 %v376_v40, %v362_v39 }
  0xa3   : > { %v408_v41 = vsel %vm407_vm0, %v403_v38, -inf }
  0xa4   : > { %409 = vmax.xlane.f32.xlu0 %v408_v41 }
  0xa6   : > { %v390_v43 = vpop.f32.mrf.mxu2 }
  0xa7   : > { %v391_v44 = vadd.f32 %v390_v43, %v377_v42  ;;  %v404_v45 = vpop.f32.mrf.mxu3 }
  0xa9   : > { %v405_v46 = vadd.f32 %v404_v45, %v391_v44 }
  0xab   : > { %v412_v47 = vsel %vm411_vm1, %v405_v46, -inf }
  0xac   : > { %413 = vmax.xlane.f32.xlu0 %v412_v47 }
 0x117   : > { %v410_v48 = vpop.xlane.xlu0 %409 }
 0x118   : > { %v415_v49 = vsub.f32 %v403_v38, %v410_v48 }
 0x11a   : > { %v417_v50 = vmul.f32 1.442695, %v415_v49 }
 0x11c   : > { %762 = vpow2.f32 %v417_v50 }
 0x11f   : > { %v414_v51 = vpop.xlane.xlu0 %413 }
 0x120   : > { %v416_v52 = vsub.f32 %v405_v46, %v414_v51 }
 0x122   : > { %v763_v53 = vpop.eup %762  ;;  %v419_v54 = vmul.f32 1.442695, %v416_v52 }
 0x123   : > { %v421_v55 = vsel %vm407_vm0, %v763_v53, 0.0 }
 0x124   : > { %764 = vpow2.f32 %v419_v54  ;;  %422 = vadd.xlane.f32.xlu1 %v421_v55 }
 0x12a   : > { %v765_v56 = vpop.eup %764 }
 0x12b   : > { %v424_v57 = vsel %vm411_vm1, %v765_v56, 0.0 }
 0x12c   : > { %425 = vadd.xlane.f32.xlu1 %v424_v57 }
 0x197   : > { %v423_v10 = vpop.xlane.xlu1 %422 }
 0x198   : > { %766 = vrcp.f32 %v423_v10  ;;  %v438_v15 = vand.u32 2147483648, %v423_v10  ;;  %v436_v17 = vand.u32 2147483647, %v423_v10  ;;  %vm432_vm4 = vweird.f32 %v423_v10 }
 0x19a   : > { %v439_v20 = vor.u32 1.1754944e-38, %v438_v15  ;;  %vm437_vm6 = vcmp.eq.f32.partialorder %v436_v17, 8.507059e+37 }
 0x19e   : > { %v767_v11 = vpop.eup %766 }
 0x19f   : > { %v428_v12 = vmul.f32 %v767_v11, %v423_v10  ;;  %v426_v13 = vpop.xlane.xlu1 %425  ;;  %vm433_vm3 = vweird.f32 %v767_v11 }
 0x1a0   : > { %768 = vrcp.f32 %v426_v13  ;;  %vm434_vm5 = vmor %vm432_vm4, %vm433_vm3  ;;  %v453_v26 = vand.u32 2147483648, %v426_v13  ;;  %v451_v28 = vand.u32 2147483647, %v426_v13  ;;  %vm447_vm8 = vweird.f32 %v426_v13 }
 0x1a1   : > { %v429_v14 = vsub.f32 1.0, %v428_v12 }
 0x1a2   : > { %v454_v30 = vor.u32 1.1754944e-38, %v453_v26  ;;  %vm452_vm10 = vcmp.eq.f32.partialorder %v451_v28, 8.507059e+37 }
 0x1a3   : > { %v430_v16 = vmul.f32 %v767_v11, %v429_v14 }
 0x1a5   : > { %v431_v18 = vadd.f32 %v767_v11, %v430_v16 }
 0x1a6   : > { %v769_v19 = vpop.eup %768 }
 0x1a7   : > { %v435_v21 = vsel %vm434_vm5, %v767_v11, %v431_v18  ;;  %v443_v22 = vmul.f32 %v769_v19, %v426_v13  ;;  %vm448_vm7 = vweird.f32 %v769_v19 }
 0x1a8   : > { %v440_v23 = vsel %vm437_vm6, %v439_v20, %v435_v21  ;;  %vm449_vm9 = vmor %vm447_vm8, %vm448_vm7 }
 0x1a9   : > { %v444_v24 = vsub.f32 1.0, %v443_v22  ;;  %v457_v25 = vmul.f32 %v763_v53, %v440_v23 }
 0x1ab   : > { %v445_v27 = vmul.f32 %v769_v19, %v444_v24  ;;  %459 = vst.msk [vmem:[%s304_s6] sm:$0xff] %vm407_vm0, %v457_v25 }
 0x1ad   : > { %v446_v29 = vadd.f32 %v769_v19, %v445_v27 }
 0x1af   : > { %v450_v31 = vsel %vm449_vm9, %v769_v19, %v446_v29 }
 0x1b0   : > { %v455_v32 = vsel %vm452_vm10, %v454_v30, %v450_v31 }
 0x1b1   : > { %v458_v33 = vmul.f32 %v765_v56, %v455_v32 }
 0x1b3   : > { %460 = vst.msk [vmem:[%s304_s6 + $0x8] sm:$0x3] %vm411_vm1, %v458_v33  ;;  %v461_v34 = vpack.c.bf16 %v458_v33, %v457_v25 }
 0x1b5   : > { %727 = vmatmul.msk.bf16.vlgmr.msrb.gmra.mxu0 %vm407_vm0, %v461_v34  ;;  %728 = vmatmul.msk.bf16.vlgmr.msrb.gmra.mxu1 %vm407_vm0, %v461_v34 }
 0x1b6   : > { %729 = vmatmul.msk.bf16.vlgmr.msrb.gmra.mxu2 %vm407_vm0, %v461_v34  ;;  %730 = vmatmul.msk.bf16.vlgmr.msrb.gmra.mxu3 %vm407_vm0, %v461_v34 }
 0x232   : > { %v487_v35 = vpop.f32.mrf.mxu0  ;;  %v501_v36 = vpop.f32.mrf.mxu1 }
 0x233   : > { %534 = vst [vmem:[%s294_s9] sm:$0xff] %v487_v35 }
 0x234   : > { %535 = vst [vmem:[%s294_s9 + $0x8] sm:$0xff] %v501_v36 }
 0x239   : > { %v515_v37 = vpop.f32.mrf.mxu2  ;;  %v529_v38 = vpop.f32.mrf.mxu3 }
 0x23a   : > { %536 = vst [vmem:[%s294_s9 + $0x10] sm:$0xff] %v515_v37  ;;  %v489_v39 = vpop.f32.mrf.mxu0  ;;  %v503_v40 = vpop.f32.mrf.mxu1 }
 0x23b   : > { %537 = vst [vmem:[%s294_s9 + $0x18] sm:$0xff] %v529_v38 }
 0x23c   : > { %538 = vst [vmem:[%s294_s9 + $0x20] sm:$0x3] %v489_v39 }
 0x23d   : > { %539 = vst [vmem:[%s294_s9 + $0x28] sm:$0x3] %v503_v40 }
 0x241   : > { %v517_v41 = vpop.f32.mrf.mxu2  ;;  %v531_v42 = vpop.f32.mrf.mxu3 }
 0x242   : > { %540 = vst [vmem:[%s294_s9 + $0x30] sm:$0x3] %v517_v41 }
 0x243   : > { %541 = vst [vmem:[%s294_s9 + $0x38] sm:$0x3] %v531_v42 }
 0x244 PF: > { %s15_s17 = sadd.s32 1, %s792_s17   ;;  %s896_s15 = smov %s788_s16 }
 0x245   : > { %p12_p5 = scmp.ge.s32.totalorder %s15_s17, 4   ;;  %s897_s16 = smov %s899_s18 }
 0x247   :  { %14 = sbr.rel (!%p12_p5) target bundleno = 2 (0x2), region = 80 }

</bundles_post_ra>
